<compile_context>
chip_gen: v7x
topology: tpu7x:2x2x1
jax: 0.10.0
libtpu: 0.0.40
codegen_flags: <defaults>
</compile_context>

<pallas_src>
import functools
import math

import jax
import jax.numpy as jnp
from jax import lax
from jax.experimental import pallas as pl
from jax.experimental.pallas import tpu as pltpu

_BN_EPS = 1e-5
_MAX_PACK = 16        # cap on the row-packing factor (keeps block-diag weights small)
_MAX_TILE_ROWS = 512  # packed rows per grid step (2048 original rows at pack=4)


# ---------------------------------------------------------------------------
# Fused MLP kernel: all 1x1-conv layers (BN pre-folded) in one kernel body.
# ---------------------------------------------------------------------------
def _fused_mlp_kernel(*refs, n_layers):
    # refs = (x_ref, w0, b0, w1, b1, ..., w_{n-1}, b_{n-1}, o_ref)
    x_ref = refs[0]
    o_ref = refs[-1]
    wb = refs[1:-1]
    cdt = x_ref.dtype                                 # streaming / MXU input dtype

    h = x_ref[...]                                    # (tm, p*Cin) rows-in-sublanes
    for i in range(n_layers):
        w = wb[2 * i][...]                            # (p*Cin_i, p*Cout_i) block-diag
        b = wb[2 * i + 1][...]                        # (1, p*Cout_i), f32
        acc = jnp.dot(h.astype(w.dtype), w,
                      preferred_element_type=jnp.float32,
                      precision=lax.Precision.HIGHEST) + b
        if i < n_layers - 1:                          # ReLU on all but the last layer
            h = jnp.maximum(acc, 0.0).astype(cdt)
        else:
            h = acc
    o_ref[...] = h.astype(o_ref.dtype)


def _row_tile(mp):
    """Packed-row tile: large enough to amortize per-grid-step overhead, but at
    least 2 grid steps whenever possible so v7x's two TensorCores both get work."""
    if mp <= 8:
        return mp                       # single tile == full dim (tiny inputs)
    half = -(-mp // 2)                  # ceil(mp / 2)
    half = -(-half // 8) * 8            # round up to a sublane multiple
    return min(_MAX_TILE_ROWS, half)


def relative_position_encoder_forward(feature, folded_params):
    """feature: (B, L, input_dim) -> (B, L, feature_dim). Matches the torch module."""
    B, L, Cin = feature.shape
    n_layers = len(folded_params)
    Cout = folded_params[-1][0].shape[1]
    dtype = feature.dtype
    M = B * L

    # Lane-dense packing: fold p consecutive rows into one kernel row so the
    # output lane width p*Cout is a multiple of 128 (unmasked vst, better MXU
    # fill).  The wrapper reshapes are free (identical row-major bytes); the
    # per-layer weights become block-diagonal so the math is unchanged.
    if Cout % 128 == 0:
        p = 1
    else:
        p = 128 // math.gcd(Cout, 128)
        if p > _MAX_PACK or M % p != 0:
            p = 1                       # fall back to masked stores, still correct
    Mp = M // p

    x = feature.reshape(Mp, p * Cin)    # no pad, no astype: zero extra HBM passes

    packed = []
    for (w, b) in folded_params:
        ci, co = w.shape
        wp = w if p == 1 else jnp.kron(jnp.eye(p, dtype=w.dtype), w)
        bp = jnp.tile(b.reshape(1, co), (1, p))
        packed.append((wp.astype(dtype), bp.astype(jnp.float32)))

    tm = _row_tile(Mp)
    grid = (pl.cdiv(Mp, tm),)           # ragged last tile: Pallas masks the writeback

    in_specs = [pl.BlockSpec((tm, p * Cin), lambda i: (i, 0))]
    args = [x]
    for (wp, bp) in packed:
        pci, pco = wp.shape
        in_specs.append(pl.BlockSpec((pci, pco), lambda i: (0, 0)))   # fetched once
        in_specs.append(pl.BlockSpec((1, pco), lambda i: (0, 0)))
        args.append(wp)
        args.append(bp)

    out = pl.pallas_call(
        functools.partial(_fused_mlp_kernel, n_layers=n_layers),
        out_shape=jax.ShapeDtypeStruct((Mp, p * Cout), dtype),
        grid=grid,
        in_specs=in_specs,
        out_specs=pl.BlockSpec((tm, p * Cout), lambda i: (i, 0)),
        compiler_params=pltpu.CompilerParams(
            dimension_semantics=("parallel",)),
    )(*args)

    return out.reshape(B, L, Cout)      # free: same row-major bytes


# ---------------------------------------------------------------------------
# Parameter construction (deterministic, synthetic) + BN folding
# ---------------------------------------------------------------------------
def init_params(key, input_dim, feature_dim, layers):
    """Raw (un-folded) params mirroring MLP([input_dim] + layers + [feature_dim])."""
    chans = [input_dim] + list(layers) + [feature_dim]
    raw = []
    for i in range(1, len(chans)):
        cin, cout = chans[i - 1], chans[i]
        key, kw, kb, kbn = jax.random.split(key, 4)
        w = jax.random.normal(kw, (cin, cout), jnp.float32) * 0.1   # Conv1d weight (Cin, Cout)
        b = jax.random.normal(kb, (cout,), jnp.float32) * 0.1       # Conv1d bias
        if i < len(chans) - 1:                                      # BatchNorm1d (eval) on hidden layers
            k1, k2, k3, k4 = jax.random.split(kbn, 4)
            gamma = 1.0 + 0.1 * jax.random.normal(k1, (cout,), jnp.float32)
            beta = 0.05 * jax.random.normal(k2, (cout,), jnp.float32)
            mean = 0.05 * jax.random.normal(k3, (cout,), jnp.float32)
            var = 1.0 + 0.1 * jax.random.uniform(k4, (cout,), jnp.float32)
            bn = (gamma, beta, mean, var)
        else:
            bn = None
        raw.append(dict(w=w, b=b, bn=bn))
    return raw


def fold_bn(raw):
    """Fold eval-mode BatchNorm into the preceding 1x1 conv: w'=w*s, b'=b*s+t."""
    folded = []
    for layer in raw:
        w, b, bn = layer["w"], layer["b"], layer["bn"]
        if bn is not None:
            gamma, beta, mean, var = bn
            scale = gamma / jnp.sqrt(var + _BN_EPS)
            shift = beta - mean * scale
            w = w * scale[None, :]
            b = b * scale + shift
        folded.append((w, b))
    return folded


def ref_forward(feature, raw):
    """Pure-JAX mirror of the torch module (transpose in/out cancels under NLC)."""
    h = feature.astype(jnp.float32)
    for layer in raw:
        h = h @ layer["w"] + layer["b"]                       # Conv1d k=1
        if layer["bn"] is not None:
            gamma, beta, mean, var = layer["bn"]
            h = (h - mean) / jnp.sqrt(var + _BN_EPS) * gamma + beta   # BatchNorm1d eval
            h = jnp.maximum(h, 0.0)                           # ReLU
    return h


# ---------------------------------------------------------------------------
if __name__ == "__main__":
    B, L = 2, 8
    INPUT_DIM, FEATURE_DIM = 4, 32
    LAYERS = [64, 32]   # hidden widths of the encoder MLP (ctor arg `layers`)

    key = jax.random.PRNGKey(0)
    k_params, k_x = jax.random.split(key)
    raw_params = init_params(k_params, INPUT_DIM, FEATURE_DIM, LAYERS)
    folded_params = fold_bn(raw_params)
    feature = jax.random.normal(k_x, (B, L, INPUT_DIM), jnp.float32)

    fwd = jax.jit(lambda f: relative_position_encoder_forward(f, folded_params))
    out = jax.block_until_ready(fwd(feature))

    assert out.shape == (B, L, FEATURE_DIM)
    assert bool(jnp.all(jnp.isfinite(out)))

    # Correctness check against the un-folded pure-JAX reference.
    ref = ref_forward(feature, raw_params)
    max_err = float(jnp.max(jnp.abs(out - ref)))
    assert bool(jnp.allclose(out, ref, rtol=1e-4, atol=1e-4)), max_err

    print("KERNEL_OK")
</pallas_src>

<mosaic_0001>
module attributes {stable_mosaic.version = 11 : i64} {
  func.func @_fused_mlp_kernel(%arg0: i32, %arg1: memref<4x16xf32, #tpu.memory_space<vmem>>, %arg2: memref<16x256xf32, #tpu.memory_space<vmem>>, %arg3: memref<1x256xf32, #tpu.memory_space<vmem>>, %arg4: memref<256x128xf32, #tpu.memory_space<vmem>>, %arg5: memref<1x128xf32, #tpu.memory_space<vmem>>, %arg6: memref<128x128xf32, #tpu.memory_space<vmem>>, %arg7: memref<1x128xf32, #tpu.memory_space<vmem>>, %arg8: memref<4x128xf32, #tpu.memory_space<vmem>>) attributes {dimension_semantics = [#tpu.dimension_semantics<parallel>], iteration_bounds = array<i64: 1>, scalar_prefetch = 0 : i64, scratch_operands = 0 : i64, tpu.core_type = #tpu.core_type<tc>, window_params = [{transform_indices = @transform_0, window_bounds = array<i64: 4, 16>}, {pipeline_mode = #tpu.pipeline_mode<synchronous>, transform_indices = @transform_1, window_bounds = array<i64: 16, 256>}, {pipeline_mode = #tpu.pipeline_mode<synchronous>, transform_indices = @transform_2, window_bounds = array<i64: 1, 256>}, {pipeline_mode = #tpu.pipeline_mode<synchronous>, transform_indices = @transform_3, window_bounds = array<i64: 256, 128>}, {pipeline_mode = #tpu.pipeline_mode<synchronous>, transform_indices = @transform_4, window_bounds = array<i64: 1, 128>}, {pipeline_mode = #tpu.pipeline_mode<synchronous>, transform_indices = @transform_5, window_bounds = array<i64: 128, 128>}, {pipeline_mode = #tpu.pipeline_mode<synchronous>, transform_indices = @transform_6, window_bounds = array<i64: 1, 128>}, {transform_indices = @transform_7, window_bounds = array<i64: 4, 128>}]} {
    %c0 = arith.constant 0 : index
    %c0_0 = arith.constant 0 : index
    %0 = vector.load %arg1[%c0, %c0_0] : memref<4x16xf32, #tpu.memory_space<vmem>>, vector<4x16xf32>
    %c0_1 = arith.constant 0 : index
    %c0_2 = arith.constant 0 : index
    %1 = vector.load %arg2[%c0_1, %c0_2] : memref<16x256xf32, #tpu.memory_space<vmem>>, vector<16x256xf32>
    %c0_3 = arith.constant 0 : index
    %c0_4 = arith.constant 0 : index
    %2 = vector.load %arg3[%c0_3, %c0_4] : memref<1x256xf32, #tpu.memory_space<vmem>>, vector<1x256xf32>
    %cst = arith.constant dense<0.000000e+00> : vector<4x256xf32>
    %3 = tpu.matmul %0, %1, %cst {dimension_numbers = #tpu.dot_dimension_numbers<[1], [0], [0], [1], [0, 0, 1, 1], [], []>, precision = #tpu.contract_precision<fp32>} : vector<4x16xf32>, vector<16x256xf32>, vector<4x256xf32> -> vector<4x256xf32>
    %4 = vector.broadcast %2 : vector<1x256xf32> to vector<4x256xf32>
    %5 = arith.addf %3, %4 : vector<4x256xf32>
    %cst_5 = arith.constant 0.000000e+00 : f32
    %6 = vector.broadcast %cst_5 : f32 to vector<4x256xf32>
    %7 = arith.maximumf %5, %6 : vector<4x256xf32>
    %c0_6 = arith.constant 0 : index
    %c0_7 = arith.constant 0 : index
    %8 = vector.load %arg4[%c0_6, %c0_7] : memref<256x128xf32, #tpu.memory_space<vmem>>, vector<256x128xf32>
    %c0_8 = arith.constant 0 : index
    %c0_9 = arith.constant 0 : index
    %9 = vector.load %arg5[%c0_8, %c0_9] : memref<1x128xf32, #tpu.memory_space<vmem>>, vector<1x128xf32>
    %cst_10 = arith.constant dense<0.000000e+00> : vector<4x128xf32>
    %10 = tpu.matmul %7, %8, %cst_10 {dimension_numbers = #tpu.dot_dimension_numbers<[1], [0], [0], [1], [0, 0, 1, 1], [], []>, precision = #tpu.contract_precision<fp32>} : vector<4x256xf32>, vector<256x128xf32>, vector<4x128xf32> -> vector<4x128xf32>
    %11 = vector.broadcast %9 : vector<1x128xf32> to vector<4x128xf32>
    %12 = arith.addf %10, %11 : vector<4x128xf32>
    %cst_11 = arith.constant 0.000000e+00 : f32
    %13 = vector.broadcast %cst_11 : f32 to vector<4x128xf32>
    %14 = arith.maximumf %12, %13 : vector<4x128xf32>
    %c0_12 = arith.constant 0 : index
    %c0_13 = arith.constant 0 : index
    %15 = vector.load %arg6[%c0_12, %c0_13] : memref<128x128xf32, #tpu.memory_space<vmem>>, vector<128x128xf32>
    %c0_14 = arith.constant 0 : index
    %c0_15 = arith.constant 0 : index
    %16 = vector.load %arg7[%c0_14, %c0_15] : memref<1x128xf32, #tpu.memory_space<vmem>>, vector<1x128xf32>
    %cst_16 = arith.constant dense<0.000000e+00> : vector<4x128xf32>
    %17 = tpu.matmul %14, %15, %cst_16 {dimension_numbers = #tpu.dot_dimension_numbers<[1], [0], [0], [1], [0, 0, 1, 1], [], []>, precision = #tpu.contract_precision<fp32>} : vector<4x128xf32>, vector<128x128xf32>, vector<4x128xf32> -> vector<4x128xf32>
    %18 = vector.broadcast %16 : vector<1x128xf32> to vector<4x128xf32>
    %19 = arith.addf %17, %18 : vector<4x128xf32>
    %c0_17 = arith.constant 0 : index
    %c0_18 = arith.constant 0 : index
    %20 = vector.load %arg8[%c0_17, %c0_18] : memref<4x128xf32, #tpu.memory_space<vmem>>, vector<4x128xf32>
    tpu.vector_store %arg8[%c0_17, %c0_18], %19 {strides = array<i32>} : memref<4x128xf32, #tpu.memory_space<vmem>>, vector<4x128xf32>,
    return
  }
  func.func @transform_0(%arg0: i32) -> (i32, i32) {
    %c0_i32 = arith.constant 0 : i32
    %c0_i32_0 = arith.constant 0 : i32
    return %arg0, %c0_i32 : i32, i32
  }
  func.func @transform_1(%arg0: i32) -> (i32, i32) {
    %c0_i32 = arith.constant 0 : i32
    %c0_i32_0 = arith.constant 0 : i32
    %c0_i32_1 = arith.constant 0 : i32
    return %c0_i32, %c0_i32_0 : i32, i32
  }
  func.func @transform_2(%arg0: i32) -> (i32, i32) {
    %c0_i32 = arith.constant 0 : i32
    %c0_i32_0 = arith.constant 0 : i32
    %c0_i32_1 = arith.constant 0 : i32
    return %c0_i32, %c0_i32_0 : i32, i32
  }
  func.func @transform_3(%arg0: i32) -> (i32, i32) {
    %c0_i32 = arith.constant 0 : i32
    %c0_i32_0 = arith.constant 0 : i32
    %c0_i32_1 = arith.constant 0 : i32
    return %c0_i32, %c0_i32_0 : i32, i32
  }
  func.func @transform_4(%arg0: i32) -> (i32, i32) {
    %c0_i32 = arith.constant 0 : i32
    %c0_i32_0 = arith.constant 0 : i32
    %c0_i32_1 = arith.constant 0 : i32
    return %c0_i32, %c0_i32_0 : i32, i32
  }
  func.func @transform_5(%arg0: i32) -> (i32, i32) {
    %c0_i32 = arith.constant 0 : i32
    %c0_i32_0 = arith.constant 0 : i32
    %c0_i32_1 = arith.constant 0 : i32
    return %c0_i32, %c0_i32_0 : i32, i32
  }
  func.func @transform_6(%arg0: i32) -> (i32, i32) {
    %c0_i32 = arith.constant 0 : i32
    %c0_i32_0 = arith.constant 0 : i32
    %c0_i32_1 = arith.constant 0 : i32
    return %c0_i32, %c0_i32_0 : i32, i32
  }
  func.func @transform_7(%arg0: i32) -> (i32, i32) {
    %c0_i32 = arith.constant 0 : i32
    %c0_i32_0 = arith.constant 0 : i32
    return %arg0, %c0_i32 : i32, i32
  }
}

</mosaic_0001>

<bundles_post_ra>
// kernel: _lambda_.1
= control target key start
LH: loop header
LB: loop body
LE: loop exit
PB: predicated region body
PF: predicated region fallthrough
CT: control target
= control target key end

     0   :  { %vm43_vm0 = vcmask 130048   ;;  %v4028_v3 = vmov 0.0   ;;  %vm3023_vm1 = vmmov 0   ;;  %s4020_s1 = inlined_call_operand.vmem [shape: f32[16,256], index: 1, kind: input, shape index: {}]   ;;  %s4021_s0 = inlined_call_operand.vmem [shape: f32[4,16], index: 0, kind: input, shape index: {}]   ;;  %s4022_s3 = inlined_call_operand.vmem [shape: f32[256,128], index: 3, kind: input, shape index: {}]   ;;  %s4023_s2 = inlined_call_operand.vmem [shape: f32[1,256], index: 2, kind: input, shape index: {}]   ;;  %s4024_s5 = inlined_call_operand.vmem [shape: f32[128,128], index: 5, kind: input, shape index: {}]   ;;  %s4025_s4 = inlined_call_operand.vmem [shape: f32[1,128], index: 4, kind: input, shape index: {}]   ;;  %s4026_s6 = inlined_call_operand.vmem [shape: f32[1,128], index: 6, kind: input, shape index: {}]   ;;  %s4027_s7 = inlined_call_operand.vmem [shape: f32[4,128], index: 7, kind: output, shape index: {}]  }
   0x1   :  { %v28_v0 = vld [vmem:[%s4020_s1 + $0x8] sm:$0xff]  ;;  %v30_v1 = vld [vmem:[%s4020_s1 + $0x18] sm:$0xff]  ;;  %v27_v2 = vld [vmem:[%s4020_s1] sm:$0xff]  ;;  %368 = vmatprep.mubr.f32.mxu0 %v4028_v3  ;;  %115 = vmatprep.mubr.f32.mxu1 %v4028_v3 }
   0x2   :  { %v47_v4 = vand.u32 4294901760, %v28_v0  ;;  %v51_v5 = vand.u32 4294901760, %v30_v1  ;;  %v29_v6 = vld [vmem:[%s4020_s1 + $0x10] sm:$0xff]  ;;  %v49_v7 = vand.u32 4294901760, %v27_v2  ;;  %v26_v8 = vld [vmem:[%s4021_s0] sm:$0xf] }
   0x3   :  { %v53_v9 = vand.u32 4294901760, %v29_v6  ;;  %v45_v10 = vsel %vm43_vm0, %v26_v8, 0  ;;  %v3090_v15 = vld [vmem:[%s4022_s3 + $0x80] sm:$0xff]  ;;  %v557_v22 = vld [vmem:[%s4022_s3 + $0x88] sm:$0xff]  ;;  %v558_v37 = vld [vmem:[%s4022_s3 + $0x90] sm:$0xff] }
   0x4   :  { %v2635_v11 = vpack.c.bf16 %v51_v5, %v47_v4  ;;  %v3081_v12 = vsub.f32 %v28_v0, %v47_v4  ;;  %v3083_v13 = vsub.f32 %v30_v1, %v51_v5  ;;  %v3085_v14 = vsub.f32 %v27_v2, %v49_v7  ;;  %v3119_v31 = vld [vmem:[%s4022_s3] sm:$0xff]  ;;  %v541_v36 = vld [vmem:[%s4022_s3 + $0x8] sm:$0xff]  ;;  %v559_v38 = vld [vmem:[%s4022_s3 + $0x98] sm:$0xff] }
   0x5   :  { %v3092_v16 = vpack.c.bf16 %v53_v9, %v49_v7  ;;  %v3094_v17 = vsub.f32 %v29_v6, %v53_v9  ;;  %v3096_v18 = vand.u32 4294901760, %v45_v10  ;;  %v628_v26 = vand.u32 4294901760, %v3090_v15  ;;  %v542_v43 = vld [vmem:[%s4022_s3 + $0x10] sm:$0xff]  ;;  %v543_v52 = vld [vmem:[%s4022_s3 + $0x18] sm:$0xff]  ;;  %v560_v53 = vld [vmem:[%s4022_s3 + $0xa0] sm:$0xff] }
   0x6   :  { %2648 = vmatprep.subr.bf16.mxu0 %v2635_v11  ;;  %2636 = vmatprep.subr.bf16.mxu1 %v2635_v11  ;;  %v129_v19 = vand.u32 4294901760, %v3081_v12  ;;  %v141_v20 = vand.u32 4294901760, %v3083_v13  ;;  %v135_v21 = vand.u32 4294901760, %v3085_v14  ;;  %v2643_v25 = vpack.c.bf16 %v3083_v13, %v3081_v12  ;;  %v561_v58 = vld [vmem:[%s4022_s3 + $0xa8] sm:$0xff]  ;;  %v544_v59 = vld [vmem:[%s4022_s3 + $0x20] sm:$0xff] }
   0x7   :  { %2650 = vmatpush1.bf16.msra.mxu0 %v3092_v16  ;;  %2638 = vmatpush1.bf16.msra.mxu1 %v3092_v16  ;;  %v3107_v23 = vsub.f32 %v45_v10, %v3096_v18  ;;  %v147_v24 = vand.u32 4294901760, %v3094_v17  ;;  %v631_v35 = vand.u32 4294901760, %v557_v22  ;;  %v3133_v42 = vsub.f32 %v3090_v15, %v628_v26  ;;  %v545_v62 = vld [vmem:[%s4022_s3 + $0x28] sm:$0xff] }
   0x8   :  { %v130_v27 = vsub.f32 %v3081_v12, %v129_v19  ;;  %v142_v28 = vsub.f32 %v3083_v13, %v141_v20  ;;  %v2651_v29 = vpack.c.bf16 %v141_v20, %v129_v19  ;;  %v136_v30 = vsub.f32 %v3085_v14, %v135_v21  ;;  %v563_v20 = vld [vmem:[%s4022_s3 + $0xb8] sm:$0xff] }
   0x9   :  { %v118_v32 = vand.u32 4294901760, %v3107_v23  ;;  %v148_v33 = vsub.f32 %v3094_v17, %v147_v24  ;;  %v2653_v34 = vpack.c.bf16 %v147_v24, %v135_v21  ;;  %4106 = vst [vmem:[#allocation2_spill] sm:$0xff] %v3133_v42  ;;  %v3139_v46 = vsub.f32 %v557_v22, %v631_v35  ;;  %v547_v24 = vld [vmem:[%s4022_s3 + $0x38] sm:$0xff] }
   0xa   :  { %v131_v39 = vand.u32 4294901760, %v130_v27  ;;  %v143_v40 = vand.u32 4294901760, %v142_v28  ;;  %2652 = vmatprep.subr.bf16.mxu0 %v2651_v29  ;;  %v137_v41 = vand.u32 4294901760, %v136_v30  ;;  %v580_v47 = vand.u32 4294901760, %v3119_v31 }
   0xb   :  { %372 = vmatmul.mubr.f32.vlgmr.msra.gmra.mrb[0].mxu0 %v118_v32  ;;  %v119_v44 = vsub.f32 %v3107_v23, %v118_v32  ;;  %v149_v45 = vand.u32 4294901760, %v148_v33  ;;  %4107 = vst [vmem:[#allocation3_spill] sm:$0xff] %v3139_v46  ;;  %v583_v49 = vand.u32 4294901760, %v541_v36  ;;  %v634_v50 = vand.u32 4294901760, %v558_v37  ;;  %v564_v32 = vld [vmem:[%s4022_s3 + $0xc0] sm:$0xff]  ;;  %v565_v33 = vld [vmem:[%s4022_s3 + $0xc8] sm:$0xff] }
   0xc   :  { %v2639_v48 = vpack.c.bf16 %v143_v40, %v131_v39  ;;  %2654 = vmatpush1.bf16.msra.mxu0 %v2653_v34  ;;  %454 = vmatprep.mubr.f32.mxu0 %v4028_v3  ;;  %v637_v51 = vand.u32 4294901760, %v559_v38  ;;  %v3150_v56 = vsub.f32 %v3119_v31, %v580_v47  ;;  %v586_v57 = vand.u32 4294901760, %v542_v43 }
   0xd   :  { %v120_v54 = vand.u32 4294901760, %v119_v44  ;;  %v2641_v55 = vpack.c.bf16 %v149_v45, %v137_v41  ;;  %2656 = vmatprep.subr.bf16.mxu0 %v2635_v11  ;;  %v3158_v60 = vsub.f32 %v541_v36, %v583_v49  ;;  %v3160_v61 = vsub.f32 %v558_v37, %v634_v50  ;;  %v548_v36 = vld [vmem:[%s4022_s3 + $0x40] sm:$0xff]  ;;  %v567_v44 = vld [vmem:[%s4022_s3 + $0xd8] sm:$0xff] }
   0xe   :  { %4108 = vst [vmem:[#allocation4_spill] sm:$0xff] %v3150_v56  ;;  %2640 = vmatprep.subr.bf16.mxu1 %v2639_v48  ;;  %v3165_v63 = vsub.f32 %v559_v38, %v637_v51  ;;  %v589_v0 = vand.u32 4294901760, %v543_v52  ;;  %v3167_v1 = vsub.f32 %v542_v43, %v586_v57  ;;  %v640_v2 = vand.u32 4294901760, %v560_v53  ;;  %v549_v38 = vld [vmem:[%s4022_s3 + $0x48] sm:$0xff]  ;;  %v566_v43 = vld [vmem:[%s4022_s3 + $0xd0] sm:$0xff] }
   0xf   :  { %4109 = vst [vmem:[#allocation5_spill] sm:$0xff] %v3158_v60  ;;  %121 = vmatmul.mubr.f32.vlgmr.msra.gmra.mrb[0].mxu1 %v120_v54  ;;  %v643_v4 = vand.u32 4294901760, %v561_v58  ;;  %v592_v5 = vand.u32 4294901760, %v544_v59  ;;  %v3170_v6 = vpack.c.bf16 %v631_v35, %v628_v26  ;;  %v595_v9 = vand.u32 4294901760, %v545_v62 }
  0x10   :  { %2642 = vmatpush1.bf16.msra.mxu1 %v2641_v55  ;;  %211 = vmatprep.mubr.f32.mxu1 %v4028_v3  ;;  %v3172_v7 = vsub.f32 %v543_v52, %v589_v0  ;;  %v3174_v8 = vsub.f32 %v560_v53, %v640_v2  ;;  %v2645_v13 = vpack.c.bf16 %v3094_v17, %v3085_v14  ;;  %v649_v22 = vand.u32 4294901760, %v563_v20  ;;  %v568_v55 = vld [vmem:[%s4022_s3 + $0xe0] sm:$0xff] }
  0x11   :  { %2644 = vmatprep.subr.bf16.mxu1 %v2643_v25  ;;  %4110 = vst [vmem:[#allocation6_spill] sm:$0xff] %v3170_v6  ;;  %v3176_v10 = vsub.f32 %v561_v58, %v643_v4  ;;  %v3178_v11 = vsub.f32 %v544_v59, %v592_v5  ;;  %v3181_v12 = vsub.f32 %v545_v62, %v595_v9  ;;  %v601_v26 = vand.u32 4294901760, %v547_v24  ;;  %v552_v62 = vld [vmem:[%s4022_s3 + $0x60] sm:$0xff] }
  0x12   :  { %v3190_v15 = vpack.c.bf16 %v583_v49, %v580_v47  ;;  %v3192_v19 = vpack.c.bf16 %v637_v51, %v634_v50  ;;  %v3196_v14 = vpack.c.bf16 %v589_v0, %v586_v57  ;;  %v3203_v17 = vpack.c.bf16 %v595_v9, %v592_v5  ;;  %v550_v49 = vld [vmem:[%s4022_s3 + $0x50] sm:$0xff]  ;;  %v551_v50 = vld [vmem:[%s4022_s3 + $0x58] sm:$0xff]  ;;  %v569_v57 = vld [vmem:[%s4022_s3 + $0xe8] sm:$0xff] }
  0x13   :  { %456 = vmatmul.mubr.f32.vlgmr.msra.gmra.mrb[0].mxu0 %v3096_v18  ;;  %v3223_v29 = vsub.f32 %v563_v20, %v649_v22  ;;  %v3236_v34 = vsub.f32 %v547_v24, %v601_v26  ;;  %v652_v35 = vand.u32 4294901760, %v564_v32  ;;  %v655_v37 = vand.u32 4294901760, %v565_v33  ;;  %v553_v0 = vld [vmem:[%s4022_s3 + $0x68] sm:$0xff] }
  0x14   :  { %2658 = vmatpush1.bf16.msra.mxu0 %v3092_v16  ;;  %530 = vmatprep.mubr.f32.mxu0 %v4028_v3  ;;  %4111 = vst [vmem:[#allocation7_spill] sm:$0xff] %v3190_v15  ;;  %4112 = vst [vmem:[#allocation8_spill] sm:$0xff] %v3192_v19  ;;  %v3199_v16 = vpack.c.bf16 %v643_v4, %v640_v2  ;;  %v604_v39 = vand.u32 4294901760, %v548_v36  ;;  %v607_v40 = vand.u32 4294901760, %v549_v38  ;;  %v658_v47 = vand.u32 4294901760, %v566_v43 }
  0x15   :  { %2660 = vmatprep.subr.bf16.mxu0 %v3170_v6  ;;  %4113 = vst [vmem:[#allocation9_spill] sm:$0xff] %v3196_v14  ;;  %4115 = vst [vmem:[#allocation11_spill] sm:$0xff] %v3203_v17  ;;  %v3245_v41 = vpack.c.bf16 %v655_v37, %v652_v35  ;;  %v661_v48 = vand.u32 4294901760, %v567_v44  ;;  %v610_v51 = vand.u32 4294901760, %v550_v49  ;;  %v613_v52 = vand.u32 4294901760, %v551_v50 }
  0x16   :  { %4114 = vst [vmem:[#allocation10_spill] sm:$0xff] %v3199_v16  ;;  %v3253_v45 = vpack.c.bf16 %v607_v40, %v604_v39  ;;  %v664_v58 = vand.u32 4294901760, %v568_v55  ;;  %v667_v59 = vand.u32 4294901760, %v569_v57  ;;  %v616_v2 = vand.u32 4294901760, %v552_v62 }
  0x17   :  { %213 = vmatmul.mubr.f32.vlgmr.msra.gmra.mrb[0].mxu1 %v3096_v18  ;;  %4118 = vst [vmem:[#allocation14_spill] sm:$0xff] %v3245_v41  ;;  %v3263_v53 = vpack.c.bf16 %v661_v48, %v658_v47  ;;  %v3265_v54 = vpack.c.bf16 %v613_v52, %v610_v51  ;;  %v619_v4 = vand.u32 4294901760, %v553_v0  ;;  %v3294_v24 = vsub.f32 %v564_v32, %v652_v35  ;;  %v555_v32 = vld [vmem:[%s4022_s3 + $0x78] sm:$0xff] }
  0x18   :  { %2646 = vmatpush1.bf16.msra.mxu1 %v2645_v13  ;;  %291 = vmatprep.mubr.f32.mxu1 %v4028_v3  ;;  %4119 = vst [vmem:[#allocation15_spill] sm:$0xff] %v3253_v45  ;;  %v3281_v5 = vpack.c.bf16 %v667_v59, %v664_v58  ;;  %v570_v13 = vld [vmem:[%s4022_s3 + $0xf0] sm:$0xff]  ;;  %v3300_v3 = vsub.f32 %v549_v38, %v607_v40 }
  0x19   :  { %4120 = vst [vmem:[#allocation16_spill] sm:$0xff] %v3263_v53  ;;  %4121 = vst [vmem:[#allocation17_spill] sm:$0xff] %v3265_v54  ;;  %v3283_v9 = vpack.c.bf16 %v619_v4, %v616_v2  ;;  %v670_v20 = vand.u32 4294901760, %v570_v13  ;;  %v3319_v35 = vsub.f32 %v569_v57, %v667_v59  ;;  %v4038_v57 = vand.u32 4294901760, %v3165_v63 }
  0x1a   :  { %4122 = vst [vmem:[#allocation18_spill] sm:$0xff] %v3281_v5 }
  0x1b   :  { %532 = vmatmul.mubr.f32.vlgmr.msra.gmra.mrb[0].mxu0 %v3096_v18  ;;  %v562_v18 = vld [vmem:[%s4022_s3 + $0xb0] sm:$0xff]  ;;  %4123 = vst [vmem:[#allocation19_spill] sm:$0xff] %v3283_v9 }
  0x1c   :  { %2662 = vmatpush3.bf16.msra.mxu0 %v3190_v15  ;;  %v646_v21 = vand.u32 4294901760, %v562_v18 }
  0x1d   :  { %2664 = vmatprep.subr.bf16.mxu0 %v3192_v19 }
  0x1e   :  { %v3219_v27 = vpack.c.bf16 %v649_v22, %v646_v21  ;;  %v3221_v28 = vsub.f32 %v562_v18, %v646_v21  ;;  %v571_v18 = vld [vmem:[%s4022_s3 + $0xf8] sm:$0xff]  ;;  %v3311_v22 = vsub.f32 %v551_v50, %v613_v52  ;;  %v4047_v50 = vand.u32 4294901760, %v3150_v56 }
  0x1f   :  { %294 = vmatmul.mubr.f32.vlgmr.msra.gmra.mrb[0].mxu1 %v3107_v23  ;;  %v546_v23 = vld [vmem:[%s4022_s3 + $0x30] sm:$0xff]  ;;  %v673_v21 = vand.u32 4294901760, %v571_v18  ;;  %v4044_v52 = vand.u32 4294901760, %v3158_v60 }
  0x20   :  { %2666 = vmatpush3.bf16.msra.mxu0 %v3196_v14  ;;  %v598_v25 = vand.u32 4294901760, %v546_v23  ;;  %4116 = vst [vmem:[#allocation12_spill] sm:$0xff] %v3219_v27  ;;  %v2723_v14 = vpack.c.bf16 %v3139_v46, %v3133_v42 }
  0x21   :  { %2668 = vmatprep.subr.bf16.mxu0 %v3199_v16  ;;  %v3325_v38 = vpack.c.bf16 %v673_v21, %v670_v20  ;;  %v3329_v40 = vsub.f32 %v571_v18, %v673_v21  ;;  %v4041_v21 = vand.u32 4294901760, %v3172_v7 }
  0x22   :  { %v3225_v30 = vpack.c.bf16 %v601_v26, %v598_v25  ;;  %v3227_v31 = vsub.f32 %v546_v23, %v598_v25  ;;  %v4049_v23 = vand.u32 4294901760, %v3139_v46  ;;  %v3296_v25 = vsub.f32 %v565_v33, %v655_v37 }
  0x23   :  { %v3298_v26 = vsub.f32 %v548_v36, %v604_v39  ;;  %v3317_v33 = vsub.f32 %v568_v55, %v664_v58  ;;  %v3321_v36 = vsub.f32 %v552_v62, %v616_v2  ;;  %v3323_v37 = vsub.f32 %v553_v0, %v619_v4  ;;  %4124 = vst [vmem:[#allocation20_spill] sm:$0xff] %v3325_v38 }
  0x24   :  { %2670 = vmatpush3.bf16.msra.mxu0 %v3203_v17  ;;  %4117 = vst [vmem:[#allocation13_spill] sm:$0xff] %v3225_v30  ;;  %v3327_v39 = vsub.f32 %v570_v13, %v670_v20  ;;  %v4039_v55 = vand.u32 4294901760, %v3160_v61  ;;  %v695_v2 = vsub.f32 %v3150_v56, %v4047_v50  ;;  %v828_v13 = vsub.f32 %v3165_v63, %v4038_v57 }
  0x25   :  { %2672 = vmatprep.subr.bf16.mxu0 %v3219_v27  ;;  %v4040_v20 = vand.u32 4294901760, %v3167_v1  ;;  %v716_v57 = vsub.f32 %v3172_v7, %v4041_v21 }
  0x26   :  { %v821_v4 = vsub.f32 %v3160_v61, %v4039_v55  ;;  %v4081_v27 = vand.u32 4294901760, %v3327_v39 }
  0x28   :  { %2674 = vmatpush3.bf16.msra.mxu0 %v3225_v30 }
  0x29   :  { %2676 = vmatprep.subr.bf16.mxu0 %v3245_v41  ;;  %v4077_v41 = vand.u32 4294901760, %v3321_v36 }
  0x2c   :  { %2678 = vmatpush3.bf16.msra.mxu0 %v3253_v45  ;;  %v3309_v45 = vsub.f32 %v550_v49, %v610_v51  ;;  %v814_v49 = vsub.f32 %v3139_v46, %v4049_v23  ;;  %v4055_v23 = vand.u32 4294901760, %v3296_v25 }
  0x2d   :  { %2680 = vmatprep.subr.bf16.mxu0 %v3263_v53  ;;  %v3305_v53 = vsub.f32 %v566_v43, %v658_v47  ;;  %v4125_v47 = vand.u32 4294901760, %v3133_v42 }
  0x2e   :  { %v815_v0 = vand.u32 4294901760, %v814_v49  ;;  %v709_v49 = vsub.f32 %v3167_v1, %v4040_v20 }
  0x30   :  { %2682 = vmatpush3.bf16.msra.mxu0 %v3265_v54  ;;  %v554_v54 = vld [vmem:[%s4022_s3 + $0x70] sm:$0xff] }
  0x31   :  { %2684 = vmatprep.subr.bf16.mxu0 %v3281_v5  ;;  %v3307_v5 = vsub.f32 %v567_v44, %v661_v48  ;;  %v622_v43 = vand.u32 4294901760, %v554_v54  ;;  %v625_v44 = vand.u32 4294901760, %v555_v32  ;;  %v807_v48 = vsub.f32 %v3133_v42, %v4125_v47 }
  0x32   :  { %v822_v47 = vand.u32 4294901760, %v821_v4  ;;  %v4046_v4 = vand.u32 4294901760, %v3181_v12 }
  0x33   :  { %v3339_v51 = vsub.f32 %v554_v54, %v622_v43  ;;  %v3344_v58 = vpack.c.bf16 %v625_v44, %v622_v43  ;;  %v3346_v59 = vsub.f32 %v555_v32, %v625_v44  ;;  %v808_v62 = vand.u32 4294901760, %v807_v48 }
  0x34   :  { %2686 = vmatpush3.bf16.msra.mxu0 %v3283_v9  ;;  %v702_v54 = vsub.f32 %v3158_v60, %v4044_v52  ;;  %v4042_v32 = vand.u32 4294901760, %v3174_v8  ;;  %v696_v43 = vand.u32 4294901760, %v695_v2  ;;  %v829_v48 = vand.u32 4294901760, %v828_v13 }
  0x35   :  { %2688 = vmatprep.subr.bf16.mxu0 %v3325_v38  ;;  %4126 = vst [vmem:[#allocation21_spill] sm:$0xff] %v3344_v58  ;;  %v2691_v18 = vpack.c.bf16 %v815_v0, %v808_v62  ;;  %v4043_v0 = vand.u32 4294901760, %v3176_v10  ;;  %v710_v13 = vand.u32 4294901760, %v709_v49  ;;  %v4053_v49 = vand.u32 4294901760, %v3227_v31 }
  0x36   :  { %v703_v44 = vand.u32 4294901760, %v702_v54  ;;  %v835_v62 = vsub.f32 %v3174_v8, %v4042_v32  ;;  %v3376_v2 = vpack.c.bf16 %v829_v48, %v822_v47  ;;  %v4045_v54 = vand.u32 4294901760, %v3178_v11 }
  0x37   :  { %v842_v21 = vsub.f32 %v3176_v10, %v4043_v0  ;;  %v4052_v47 = vand.u32 4294901760, %v3223_v29  ;;  %v4074_v9 = vand.u32 4294901760, %v3319_v35 }
  0x38   :  { %2690 = vmatpush3.bf16.msra.mxu0 %v3344_v58  ;;  %v3374_v55 = vpack.c.bf16 %v703_v44, %v696_v43  ;;  %v836_v20 = vand.u32 4294901760, %v835_v62  ;;  %v723_v32 = vsub.f32 %v3178_v11, %v4045_v54  ;;  %v730_v43 = vsub.f32 %v3181_v12, %v4046_v4 }
  0x39   :  { %2692 = vmatprep.subr.bf16.mxu0 %v2691_v18  ;;  %v717_v18 = vand.u32 4294901760, %v716_v57  ;;  %v4048_v44 = vand.u32 4294901760, %v3221_v28  ;;  %v843_v57 = vand.u32 4294901760, %v842_v21  ;;  %v4054_v62 = vand.u32 4294901760, %v3236_v34 }
  0x3a   :  { %v724_v0 = vand.u32 4294901760, %v723_v32  ;;  %v731_v52 = vand.u32 4294901760, %v730_v43  ;;  %v856_v4 = vsub.f32 %v3223_v29, %v4052_v47  ;;  %v737_v21 = vsub.f32 %v3227_v31, %v4053_v49 }
  0x3b   :  { %v3391_v48 = vpack.c.bf16 %v717_v18, %v710_v13  ;;  %v849_v54 = vsub.f32 %v3221_v28, %v4048_v44  ;;  %v3401_v50 = vpack.c.bf16 %v843_v57, %v836_v20  ;;  %v744_v13 = vsub.f32 %v3236_v34, %v4054_v62 }
  0x3c   :  { %v4056_v32 = vand.u32 4294901760, %v3294_v24  ;;  %v3410_v18 = vpack.c.bf16 %v731_v52, %v724_v0  ;;  %v857_v44 = vand.u32 4294901760, %v856_v4  ;;  %v738_v58 = vand.u32 4294901760, %v737_v21 }
  0x3d   :  { %v850_v43 = vand.u32 4294901760, %v849_v54  ;;  %v745_v47 = vand.u32 4294901760, %v744_v13  ;;  %v4057_v57 = vand.u32 4294901760, %v3298_v26  ;;  %v870_v62 = vsub.f32 %v3296_v25, %v4055_v23 }
  0x3e   :  { %v863_v20 = vsub.f32 %v3294_v24, %v4056_v32  ;;  %v4058_v52 = vand.u32 4294901760, %v3300_v3  ;;  %v4061_v21 = vand.u32 4294901760, %v3305_v53  ;;  %v4067_v23 = vand.u32 4294901760, %v3309_v45 }
  0x3f   :  { %v3417_v49 = vpack.c.bf16 %v857_v44, %v850_v43  ;;  %v3423_v0 = vpack.c.bf16 %v745_v47, %v738_v58  ;;  %v751_v4 = vsub.f32 %v3298_v26, %v4057_v57  ;;  %v871_v13 = vand.u32 4294901760, %v870_v62 }
  0x40   :  { %v864_v54 = vand.u32 4294901760, %v863_v20  ;;  %v758_v44 = vsub.f32 %v3300_v3, %v4058_v52  ;;  %v4066_v43 = vand.u32 4294901760, %v3307_v5  ;;  %v877_v58 = vsub.f32 %v3305_v53, %v4061_v21 }
  0x41   :  { %v752_v32 = vand.u32 4294901760, %v751_v4  ;;  %v4068_v47 = vand.u32 4294901760, %v3311_v22  ;;  %v765_v52 = vsub.f32 %v3309_v45, %v4067_v23  ;;  %v4071_v21 = vand.u32 4294901760, %v3317_v33 }
  0x42   :  { %v3438_v20 = vpack.c.bf16 %v871_v13, %v864_v54  ;;  %v759_v57 = vand.u32 4294901760, %v758_v44  ;;  %v884_v62 = vsub.f32 %v3307_v5, %v4066_v43  ;;  %v878_v38 = vand.u32 4294901760, %v877_v58 }
  0x43   :  { %v772_v4 = vsub.f32 %v3311_v22, %v4068_v47  ;;  %v766_v44 = vand.u32 4294901760, %v765_v52  ;;  %v891_v23 = vsub.f32 %v3317_v33, %v4071_v21  ;;  %v898_v58 = vsub.f32 %v3319_v35, %v4074_v9 }
  0x44   :  { %v3451_v54 = vpack.c.bf16 %v759_v57, %v752_v32  ;;  %v885_v13 = vand.u32 4294901760, %v884_v62  ;;  %v4078_v47 = vand.u32 4294901760, %v3323_v37  ;;  %v779_v32 = vsub.f32 %v3321_v36, %v4077_v41 }
  0x45   :  { %v773_v43 = vand.u32 4294901760, %v772_v4  ;;  %v892_v52 = vand.u32 4294901760, %v891_v23  ;;  %v899_v62 = vand.u32 4294901760, %v898_v58  ;;  %v4084_v9 = vand.u32 4294901760, %v3329_v40 }
  0x46   :  { %v3461_v30 = vpack.c.bf16 %v885_v13, %v878_v38  ;;  %v786_v4 = vsub.f32 %v3323_v37, %v4078_v47  ;;  %v780_v21 = vand.u32 4294901760, %v779_v32  ;;  %v4086_v38 = vand.u32 4294901760, %v3339_v51 }
  0x47   :  { %v3466_v57 = vpack.c.bf16 %v773_v43, %v766_v44  ;;  %v3474_v13 = vpack.c.bf16 %v899_v62, %v892_v52  ;;  %v4085_v41 = vand.u32 4294901760, %v3346_v59  ;;  %v905_v23 = vsub.f32 %v3327_v39, %v4081_v27 }
  0x48   :  { %v787_v17 = vand.u32 4294901760, %v786_v4  ;;  %v912_v43 = vsub.f32 %v3329_v40, %v4084_v9  ;;  %v793_v44 = vsub.f32 %v3339_v51, %v4086_v38  ;;  %v2725_v9 = vpack.c.bf16 %v3158_v60, %v3150_v56 }
  0x49   :  { %v800_v32 = vsub.f32 %v3346_v59, %v4085_v41  ;;  %v906_v52 = vand.u32 4294901760, %v905_v23 }
  0x4a   :  { %v3486_v58 = vpack.c.bf16 %v787_v17, %v780_v21  ;;  %v913_v62 = vand.u32 4294901760, %v912_v43  ;;  %v794_v4 = vand.u32 4294901760, %v793_v44 }
  0x4b   :  { %v801_v47 = vand.u32 4294901760, %v800_v32 }
  0x4c   :  { %v2719_v16 = vpack.c.bf16 %v913_v62, %v906_v52  ;;  %v31_v62 = vld [vmem:[%s4023_s2] sm:$0x3] }
  0x4d   :  { %v2721_v27 = vpack.c.bf16 %v801_v47, %v794_v4  ;;  %v33_v47 = vlaneseq }
  0x4f   :  { %v34_v52 = vshrl.u32 %v33_v47, 7 }
  0x51   :  { %v35_v43 = vsub.s32 0, %v34_v52  ;;  %v39_v4 = vsub.s32 1, %v34_v52 }
  0x53   :  { %v36_v41 = vrot.slane %v31_v62, %v35_v43  ;;  %v40_v17 = vrot.slane %v31_v62, %v39_v4  ;;  %v4152_v4 = vld [vmem:[#allocation17_spill] sm:$0xff] }
  0xee   :  { %v533_v23 = vpop.f32.mrb[0].mxu0 }
  0xef   :  { %v535_v21 = vpop.f32.mrb[1].mxu0 }
  0xf2   :  { %v295_v60 = vpop.f32.mrb[0].mxu1 }
  0xf3   :  { %v2995_v38 = vadd.f32 %v295_v60, %v36_v41  ;;  %v297_v56 = vpop.f32.mrb[1].mxu1 }
  0xf4   :  { %v2997_v46 = vadd.f32 %v297_v56, %v40_v17  ;;  %v4147_v17 = vld [vmem:[#allocation12_spill] sm:$0xff] }
  0xf5   :  { %v2996_v44 = vadd.f32 %v2995_v38, %v533_v23  ;;  %v4144_v38 = vld [vmem:[#allocation9_spill] sm:$0xff]  ;;  %v4149_v23 = vld [vmem:[#allocation14_spill] sm:$0xff] }
  0xf6   :  { %v2998_v42 = vadd.f32 %v2997_v46, %v535_v21  ;;  %v4148_v21 = vld [vmem:[#allocation13_spill] sm:$0xff] }
  0xf7   :  { %v538_v19 = vmax.f32 %v2996_v44, 0.0  ;;  %v4150_v44 = vld [vmem:[#allocation15_spill] sm:$0xff] }
  0xf8   :  { %v539_v32 = vmax.f32 %v2998_v42, 0.0  ;;  %v4127_v42 = vpack.c.bf16 %v3165_v63, %v3160_v61 }
  0xf9   :  { %v3526_v15 = vand.u32 4294901760, %v538_v19 }
  0xfa   :  { %v3528_v47 = vand.u32 4294901760, %v539_v32 }
  0xfb   :  { %v3531_v6 = vsub.f32 %v538_v19, %v3526_v15  ;;  %v4128_v19 = vpack.c.bf16 %v3172_v7, %v3167_v1 }
  0xfc   :  { %v676_v52 = vsub.f32 %v539_v32, %v3528_v47  ;;  %v4151_v32 = vld [vmem:[#allocation16_spill] sm:$0xff] }
  0xfd   :  { %v683_v43 = vand.u32 4294901760, %v3531_v6 }
  0xfe   :  { %v677_v62 = vand.u32 4294901760, %v676_v52 }
  0xff   :  { %v684_v56 = vsub.f32 %v3531_v6, %v683_v43 }
 0x100   :  { %v678_v60 = vsub.f32 %v676_v52, %v677_v62 }
 0x101   :  { %v685_v41 = vand.u32 4294901760, %v684_v56  ;;  %v4155_v56 = vld [vmem:[#allocation20_spill] sm:$0xff] }
 0x102   :  { %v679_v46 = vand.u32 4294901760, %v678_v60  ;;  %v4156_v60 = vld [vmem:[#allocation2_spill] sm:$0xff] }
 0x104   :  { %680 = vmatprep.mubr.f32.mxu0 %v679_v46  ;;  %v4157_v46 = vand.u32 4294901760, %v4156_v60  ;;  %v4169_v60 = vand.u32 4294901760, %v3174_v8 }
 0x105   :  { %686 = vmatmul.mubr.f32.vlgmr.msra.gmra.mrb[2].mxu0 %v685_v41  ;;  %v4158_v41 = vld [vmem:[#allocation3_spill] sm:$0xff] }
 0x106   :  { %2694 = vmatpush3.bf16.msra.mxu0 %v3374_v55  ;;  %916 = vmatprep.mubr.f32.mxu0 %v3528_v47  ;;  %v4135_v55 = vpack.c.bf16 %v3307_v5, %v3305_v53 }
 0x107   :  { %2696 = vmatprep.subr.bf16.mxu0 %v3376_v2  ;;  %v4136_v2 = vpack.c.bf16 %v3311_v22, %v3309_v45 }
 0x10a   :  { %2698 = vmatpush3.bf16.msra.mxu0 %v3391_v48  ;;  %v4137_v48 = vpack.c.bf16 %v3319_v35, %v3317_v33 }
 0x10b   :  { %2700 = vmatprep.subr.bf16.mxu0 %v3401_v50  ;;  %v4134_v50 = vpack.c.bf16 %v3300_v3, %v3298_v26 }
 0x10e   :  { %2702 = vmatpush3.bf16.msra.mxu0 %v3410_v18  ;;  %v4139_v18 = vpack.c.bf16 %v3329_v40, %v3327_v39 }
 0x10f   :  { %2704 = vmatprep.subr.bf16.mxu0 %v3417_v49  ;;  %v4138_v49 = vpack.c.bf16 %v3323_v37, %v3321_v36 }
 0x112   :  { %2706 = vmatpush3.bf16.msra.mxu0 %v3423_v0  ;;  %v4140_v0 = vpack.c.bf16 %v3346_v59, %v3339_v51 }
 0x113   :  { %2708 = vmatprep.subr.bf16.mxu0 %v3438_v20  ;;  %v4141_v20 = vld [vmem:[#allocation6_spill] sm:$0xff] }
 0x116   :  { %2710 = vmatpush3.bf16.msra.mxu0 %v3451_v54  ;;  %v4142_v54 = vld [vmem:[#allocation7_spill] sm:$0xff] }
 0x117   :  { %2712 = vmatprep.subr.bf16.mxu0 %v3461_v30  ;;  %v4129_v30 = vpack.c.bf16 %v3176_v10, %v3174_v8  ;;  %v4176_v8 = vand.u32 4294901760, %v3236_v34 }
 0x11a   :  { %2714 = vmatpush3.bf16.msra.mxu0 %v3466_v57  ;;  %v4143_v57 = vld [vmem:[#allocation8_spill] sm:$0xff] }
 0x11b   :  { %2716 = vmatprep.subr.bf16.mxu0 %v3474_v13  ;;  %v4145_v13 = vld [vmem:[#allocation10_spill] sm:$0xff] }
 0x11e   :  { %2718 = vmatpush3.bf16.msra.mxu0 %v3486_v58  ;;  %v4146_v58 = vld [vmem:[#allocation11_spill] sm:$0xff] }
 0x11f   :  { %2720 = vmatprep.subr.bf16.mxu0 %v2719_v16  ;;  %v4130_v16 = vpack.c.bf16 %v3181_v12, %v3178_v11 }
 0x122   :  { %2722 = vmatpush3.bf16.msra.mxu0 %v2721_v27  ;;  %v4132_v27 = vpack.c.bf16 %v3236_v34, %v3227_v31  ;;  %v4183_v34 = vand.u32 4294901760, %v3309_v45  ;;  %v4190_v45 = vand.u32 4294901760, %v3329_v40  ;;  %v1442_v40 = vld [vmem:[%s4024_s5] sm:$0xff] }
 0x123   :  { %2724 = vmatprep.subr.bf16.mxu0 %v2723_v14  ;;  %v4131_v14 = vpack.c.bf16 %v3223_v29, %v3221_v28 }
 0x125   :  { %918 = vmatmul.mubr.f32.vlgmr.msra.gmra.mrb[4].mxu0 %v3526_v15 }
 0x126   :  { %2726 = vmatpush3.bf16.msra.mxu0 %v2725_v9  ;;  %1053 = vmatprep.mubr.f32.mxu0 %v676_v52  ;;  %v4133_v9 = vpack.c.bf16 %v3296_v25, %v3294_v24  ;;  %v4153_v52 = vld [vmem:[#allocation18_spill] sm:$0xff] }
 0x127   :  { %2728 = vmatprep.subr.bf16.mxu0 %v4127_v42  ;;  %v4159_v42 = vand.u32 4294901760, %v4158_v41  ;;  %v4173_v41 = vand.u32 4294901760, %v3221_v28  ;;  %v4180_v28 = vand.u32 4294901760, %v3300_v3  ;;  %v4187_v3 = vand.u32 4294901760, %v3321_v36 }
 0x12a   :  { %2730 = vmatpush3.bf16.msra.mxu0 %v4128_v19  ;;  %v2787_v19 = vpack.c.bf16 %v4159_v42, %v4157_v46  ;;  %v4170_v46 = vand.u32 4294901760, %v3176_v10  ;;  %v4177_v10 = vand.u32 4294901760, %v3294_v24  ;;  %v4184_v24 = vand.u32 4294901760, %v3311_v22 }
 0x12b   :  { %2732 = vmatprep.subr.bf16.mxu0 %v4129_v30  ;;  %v4160_v30 = vld [vmem:[#allocation21_spill] sm:$0xff]  ;;  %v4191_v22 = vand.u32 4294901760, %v3339_v51  ;;  %v1443_v51 = vld [vmem:[%s4024_s5 + $0x8] sm:$0xff] }
 0x12e   :  { %2734 = vmatpush3.bf16.msra.mxu0 %v4130_v16  ;;  %v4161_v16 = vld [vmem:[#allocation4_spill] sm:$0xff] }
 0x12f   :  { %2736 = vmatprep.subr.bf16.mxu0 %v4131_v14  ;;  %v4162_v14 = vand.u32 4294901760, %v4161_v16 }
 0x132   :  { %2738 = vmatpush3.bf16.msra.mxu0 %v4132_v27  ;;  %v4163_v27 = vld [vmem:[#allocation5_spill] sm:$0xff] }
 0x133   :  { %2740 = vmatprep.subr.bf16.mxu0 %v4133_v9  ;;  %v4164_v9 = vand.u32 4294901760, %v4163_v27 }
 0x136   :  { %2742 = vmatpush3.bf16.msra.mxu0 %v4134_v50  ;;  %v2789_v50 = vpack.c.bf16 %v4164_v9, %v4162_v14  ;;  %v2809_v9 = vpack.c.bf16 %v4184_v24, %v4183_v34  ;;  %v1455_v34 = vld [vmem:[%s4024_s5 + $0x68] sm:$0xff] }
 0x137   :  { %2744 = vmatprep.subr.bf16.mxu0 %v4135_v55  ;;  %v4165_v55 = vand.u32 4294901760, %v3160_v61  ;;  %v2795_v61 = vpack.c.bf16 %v4170_v46, %v4169_v60 }
 0x13a   :  { %2746 = vmatpush3.bf16.msra.mxu0 %v4136_v2  ;;  %v4166_v2 = vand.u32 4294901760, %v3165_v63  ;;  %v4171_v63 = vand.u32 4294901760, %v3178_v11  ;;  %v4178_v11 = vand.u32 4294901760, %v3296_v25  ;;  %v4185_v25 = vand.u32 4294901760, %v3317_v33 }
 0x13b   :  { %2748 = vmatprep.subr.bf16.mxu0 %v4137_v48  ;;  %v4192_v33 = vand.u32 4294901760, %v3346_v59  ;;  %v1444_v59 = vld [vmem:[%s4024_s5 + $0x10] sm:$0xff] }
 0x13c   :  { %v2791_v48 = vpack.c.bf16 %v4166_v2, %v4165_v55  ;;  %v2803_v16 = vpack.c.bf16 %v4178_v11, %v4177_v10  ;;  %v1452_v10 = vld [vmem:[%s4024_s5 + $0x50] sm:$0xff]  ;;  %v1453_v11 = vld [vmem:[%s4024_s5 + $0x58] sm:$0xff] }
 0x13e   :  { %2750 = vmatpush3.bf16.msra.mxu0 %v4138_v49  ;;  %v4167_v49 = vand.u32 4294901760, %v3167_v1  ;;  %v4174_v1 = vand.u32 4294901760, %v3223_v29  ;;  %v4181_v29 = vand.u32 4294901760, %v3305_v53  ;;  %v4188_v53 = vand.u32 4294901760, %v3323_v37 }
 0x13f   :  { %2752 = vmatprep.subr.bf16.mxu0 %v4139_v18  ;;  %v4168_v18 = vand.u32 4294901760, %v3172_v7  ;;  %v4175_v7 = vand.u32 4294901760, %v3227_v31  ;;  %v4182_v31 = vand.u32 4294901760, %v3307_v5  ;;  %v4189_v5 = vand.u32 4294901760, %v3327_v39 }
 0x140   :  { %v2799_v42 = vpack.c.bf16 %v4174_v1, %v4173_v41  ;;  %v2813_v55 = vpack.c.bf16 %v4188_v53, %v4187_v3  ;;  %v3022_v39 = vmov 0.0|0.0  }
 0x141   :  { %v2807_v27 = vpack.c.bf16 %v4182_v31, %v4181_v29  ;;  %v2815_v2 = vpack.c.bf16 %v4190_v45, %v4189_v5  ;;  %2851 = vmatprep.subr.bf16.mxu1 %v3022_v39 }
 0x142   :  { %2754 = vmatpush3.bf16.msra.mxu0 %v4140_v0  ;;  %v2793_v0 = vpack.c.bf16 %v4168_v18, %v4167_v49 }
 0x143   :  { %2756 = vmatprep.subr.bf16.mxu0 %v4141_v20 }
 0x145   :  { %1056 = vmatmul.mubr.f32.vlgmr.msra.gmra.mrb[6].mxu0 %v3531_v6  ;;  %v4172_v6 = vand.u32 4294901760, %v3181_v12  ;;  %v4179_v12 = vand.u32 4294901760, %v3298_v26  ;;  %v4186_v26 = vand.u32 4294901760, %v3319_v35 }
 0x146   :  { %2758 = vmatpush3.bf16.msra.mxu0 %v4142_v54  ;;  %1160 = vmatprep.mubr.f32.mxu0 %v677_v62  ;;  %v4154_v62 = vld [vmem:[#allocation19_spill] sm:$0xff] }
 0x147   :  { %2760 = vmatprep.subr.bf16.mxu0 %v4143_v57  ;;  %v2805_v14 = vpack.c.bf16 %v4180_v28, %v4179_v12  ;;  %v1496_v28 = vand.u32 4294901760, %v1452_v10 }
 0x14a   :  { %2762 = vmatpush3.bf16.msra.mxu0 %v4144_v38 }
 0x14b   :  { %2764 = vmatprep.subr.bf16.mxu0 %v4145_v13 }
 0x14e   :  { %2766 = vmatpush3.bf16.msra.mxu0 %v4146_v58 }
 0x14f   :  { %2768 = vmatprep.subr.bf16.mxu0 %v4147_v17 }
 0x152   :  { %2770 = vmatpush3.bf16.msra.mxu0 %v4148_v21 }
 0x153   :  { %2772 = vmatprep.subr.bf16.mxu0 %v4149_v23 }
 0x156   :  { %2774 = vmatpush3.bf16.msra.mxu0 %v4150_v44 }
 0x157   :  { %2776 = vmatprep.subr.bf16.mxu0 %v4151_v32 }
 0x15a   :  { %2778 = vmatpush3.bf16.msra.mxu0 %v4152_v4 }
 0x15b   :  { %2780 = vmatprep.subr.bf16.mxu0 %v4153_v52 }
 0x15e   :  { %2782 = vmatpush3.bf16.msra.mxu0 %v4154_v62 }
 0x15f   :  { %2784 = vmatprep.subr.bf16.mxu0 %v4155_v56 }
 0x162   :  { %2786 = vmatpush3.bf16.msra.mxu0 %v4160_v30 }
 0x163   :  { %2788 = vmatprep.subr.bf16.mxu0 %v2787_v19  ;;  %v2801_v19 = vpack.c.bf16 %v4176_v8, %v4175_v7 }
 0x165   :  { %1164 = vmatmul.mubr.f32.vlgmr.msra.gmra.mrb[8].mxu0 %v683_v43  ;;  %v2797_v43 = vpack.c.bf16 %v4172_v6, %v4171_v63  ;;  %v1450_v6 = vld [vmem:[%s4024_s5 + $0x40] sm:$0xff] }
 0x166   :  { %2790 = vmatpush3.bf16.msra.mxu0 %v2789_v50  ;;  %1330 = vmatprep.mubr.f32.mxu0 %v3528_v47  ;;  %v2811_v50 = vpack.c.bf16 %v4186_v26, %v4185_v25  ;;  %v1490_v41 = vand.u32 4294901760, %v1450_v6  ;;  %v1456_v26 = vld [vmem:[%s4024_s5 + $0x70] sm:$0xff] }
 0x167   :  { %2792 = vmatprep.subr.bf16.mxu0 %v2791_v48  ;;  %v2817_v48 = vpack.c.bf16 %v4192_v33, %v4191_v22  ;;  %v1508_v3 = vand.u32 4294901760, %v1456_v26  ;;  %v3802_v22 = vsub.f32 %v1452_v10, %v1496_v28 }
 0x168   :  { %v3798_v45 = vsub.f32 %v1450_v6, %v1490_v41 }
 0x16a   :  { %2794 = vmatpush3.bf16.msra.mxu0 %v2793_v0 }
 0x16b   :  { %2796 = vmatprep.subr.bf16.mxu0 %v2795_v61 }
 0x16e   :  { %2798 = vmatpush3.bf16.msra.mxu0 %v2797_v43  ;;  %v1451_v43 = vld [vmem:[%s4024_s5 + $0x48] sm:$0xff] }
 0x16f   :  { %2800 = vmatprep.subr.bf16.mxu0 %v2799_v42  ;;  %v1493_v1 = vand.u32 4294901760, %v1451_v43  ;;  %v2111_v42 = vld [vmem:[%s4025_s4] ss:$0 sm:$0xff] }
 0x171   :  { %v3764_v8 = vpack.c.bf16 %v1493_v1, %v1490_v41 }
 0x172   :  { %2802 = vmatpush3.bf16.msra.mxu0 %v2801_v19 }
 0x173   :  { %2804 = vmatprep.subr.bf16.mxu0 %v2803_v16 }
 0x176   :  { %2806 = vmatpush3.bf16.msra.mxu0 %v2805_v14  ;;  %v1499_v14 = vand.u32 4294901760, %v1453_v11 }
 0x177   :  { %2808 = vmatprep.subr.bf16.mxu0 %v2807_v27  ;;  %v1454_v27 = vld [vmem:[%s4024_s5 + $0x60] sm:$0xff] }
 0x178   :  { %v3776_v31 = vpack.c.bf16 %v1499_v14, %v1496_v28  ;;  %v1502_v24 = vand.u32 4294901760, %v1454_v27  ;;  %v3804_v33 = vsub.f32 %v1453_v11, %v1499_v14  ;;  %v4104_v28 = vand.u32 4294901760, %v3798_v45 }
 0x17a   :  { %2810 = vmatpush3.bf16.msra.mxu0 %v2809_v9  ;;  %v1505_v9 = vand.u32 4294901760, %v1455_v34 }
 0x17b   :  { %2812 = vmatprep.subr.bf16.mxu0 %v2811_v50  ;;  %v1457_v50 = vld [vmem:[%s4024_s5 + $0x78] sm:$0xff] }
 0x17c   :  { %v3786_v25 = vpack.c.bf16 %v1505_v9, %v1502_v24  ;;  %v1511_v53 = vand.u32 4294901760, %v1457_v50 }
 0x17e   :  { %2814 = vmatpush3.bf16.msra.mxu0 %v2813_v55 }
 0x17f   :  { %2816 = vmatprep.subr.bf16.mxu0 %v2815_v2  ;;  %v3800_v2 = vsub.f32 %v1451_v43, %v1493_v1 }
 0x181   :  { %v4103_v14 = vand.u32 4294901760, %v3800_v2 }
 0x182   :  { %2818 = vmatpush3.bf16.msra.mxu0 %v2817_v48  ;;  %v3806_v48 = vsub.f32 %v1454_v27, %v1502_v24 }
 0x183   :  { %2820 = vmatprep.subr.bf16.mxu0 %v4141_v20  ;;  %v1445_v20 = vld [vmem:[%s4024_s5 + $0x18] sm:$0xff]  ;;  %v1623_v24 = vsub.f32 %v3800_v2, %v4103_v14 }
 0x185   :  { %1332 = vmatmul.mubr.f32.vlgmr.msra.gmra.mrb[10].mxu0 %v3526_v15 }
 0x186   :  { %2822 = vmatpush3.bf16.msra.mxu0 %v4142_v54  ;;  %1434 = vmatprep.mubr.f32.mxu0 %v3528_v47  ;;  %v1466_v47 = vand.u32 4294901760, %v1442_v40  ;;  %v1472_v54 = vand.u32 4294901760, %v1444_v59 }
 0x187   :  { %2824 = vmatprep.subr.bf16.mxu0 %v4143_v57  ;;  %v1446_v57 = vld [vmem:[%s4024_s5 + $0x20] sm:$0xff] }
 0x18a   :  { %2826 = vmatpush3.bf16.msra.mxu0 %v4144_v38  ;;  %v1447_v38 = vld [vmem:[%s4024_s5 + $0x28] sm:$0xff] }
 0x18b   :  { %2828 = vmatprep.subr.bf16.mxu0 %v4145_v13  ;;  %v1475_v13 = vand.u32 4294901760, %v1445_v20 }
 0x18e   :  { %2830 = vmatpush3.bf16.msra.mxu0 %v4146_v58  ;;  %v1478_v58 = vand.u32 4294901760, %v1446_v57 }
 0x18f   :  { %2832 = vmatprep.subr.bf16.mxu0 %v4147_v17  ;;  %v1481_v17 = vand.u32 4294901760, %v1447_v38 }
 0x191   :  { %v3738_v49 = vsub.f32 %v1447_v38, %v1481_v17  ;;  %v3746_v61 = vpack.c.bf16 %v1481_v17, %v1478_v58 }
 0x192   :  { %2834 = vmatpush3.bf16.msra.mxu0 %v4148_v21  ;;  %v1448_v21 = vld [vmem:[%s4024_s5 + $0x30] sm:$0xff] }
 0x193   :  { %2836 = vmatprep.subr.bf16.mxu0 %v4149_v23  ;;  %v1449_v23 = vld [vmem:[%s4024_s5 + $0x38] sm:$0xff]  ;;  %v1484_v18 = vand.u32 4294901760, %v1448_v21 }
 0x194   :  { %v1487_v0 = vand.u32 4294901760, %v1449_v23 }
 0x195   :  { %v3741_v60 = vsub.f32 %v1448_v21, %v1484_v18 }
 0x196   :  { %2838 = vmatpush3.bf16.msra.mxu0 %v4150_v44  ;;  %v3743_v46 = vsub.f32 %v1449_v23, %v1487_v0  ;;  %v3750_v63 = vpack.c.bf16 %v1487_v0, %v1484_v18  ;;  %v1594_v18 = vand.u32 4294901760, %v3738_v49 }
 0x197   :  { %2840 = vmatprep.subr.bf16.mxu0 %v4151_v32  ;;  %v3725_v32 = vsub.f32 %v1442_v40, %v1466_v47  ;;  %v3814_v40 = vsub.f32 %v1457_v50, %v1511_v53  ;;  %v4102_v50 = vand.u32 4294901760, %v3802_v22 }
 0x198   :  { %v1595_v43 = vsub.f32 %v3738_v49, %v1594_v18 }
 0x199   :  { %v1559_v55 = vand.u32 4294901760, %v3725_v32 }
 0x19a   :  { %2842 = vmatpush3.bf16.msra.mxu0 %v4152_v4  ;;  %v1596_v1 = vand.u32 4294901760, %v1595_v43 }
 0x19b   :  { %2844 = vmatprep.subr.bf16.mxu0 %v4153_v52  ;;  %v3729_v52 = vsub.f32 %v1444_v59, %v1472_v54 }
 0x19e   :  { %2846 = vmatpush3.bf16.msra.mxu0 %v4154_v62  ;;  %v3731_v62 = vsub.f32 %v1445_v20, %v1475_v13 }
 0x19f   :  { %2848 = vmatprep.subr.bf16.mxu0 %v4155_v56  ;;  %v3733_v56 = vsub.f32 %v1446_v57, %v1478_v58 }
 0x1a0   :  { %v1580_v20 = vand.u32 4294901760, %v3731_v62 }
 0x1a1   :  { %v1587_v23 = vand.u32 4294901760, %v3733_v56 }
 0x1a2   :  { %2850 = vmatpush3.bf16.msra.mxu0 %v4160_v30  ;;  %v3736_v30 = vpack.c.bf16 %v1475_v13, %v1472_v54  ;;  %v1581_v13 = vsub.f32 %v3731_v62, %v1580_v20 }
 0x1a3   :  { %v1588_v6 = vsub.f32 %v3733_v56, %v1587_v23 }
 0x1a4   :  { %v1582_v21 = vand.u32 4294901760, %v1581_v13 }
 0x1a5   :  { %1436 = vmatmul.mubr.f32.vlgmr.msra.gmra.mrb[12].mxu0 %v3526_v15  ;;  %v1469_v15 = vand.u32 4294901760, %v1443_v51  ;;  %v1589_v41 = vand.u32 4294901760, %v1588_v6 }
 0x1a7   :  { %v3723_v44 = vpack.c.bf16 %v1469_v15, %v1466_v47  ;;  %v3727_v4 = vsub.f32 %v1443_v51, %v1469_v15  ;;  %v1560_v51 = vsub.f32 %v3725_v32, %v1559_v55  ;;  %v4193_v47 = vmov 0.0  }
 0x1a8   :  { %2457 = vmatprep.mubr.msk.f32.mxu1 %vm3023_vm1, %v4193_v47  ;;  %v1573_v15 = vand.u32 4294901760, %v3729_v52 }
 0x1a9   :  { %2853 = vmatpush3.bf16.msra.mxu1 %v3723_v44  ;;  %v1566_v5 = vand.u32 4294901760, %v3727_v4  ;;  %v1561_v54 = vand.u32 4294901760, %v1560_v51 }
 0x1aa   :  { %2854 = vmatprep.subr.bf16.mxu1 %v3022_v39  ;;  %v1574_v38 = vsub.f32 %v3729_v52, %v1573_v15 }
 0x1ab   :  { %v1567_v59 = vsub.f32 %v3727_v4, %v1566_v5 }
 0x1ac   :  { %v1575_v17 = vand.u32 4294901760, %v1574_v38 }
 0x1ad   :  { %2856 = vmatpush3.bf16.msra.mxu1 %v3736_v30  ;;  %v1568_v57 = vand.u32 4294901760, %v1567_v59 }
 0x1ae   :  { %2857 = vmatprep.subr.bf16.mxu1 %v3022_v39  ;;  %v3838_v0 = vpack.c.bf16 %v1582_v21, %v1575_v17  ;;  %v4100_v21 = vand.u32 4294901760, %v3806_v48 }
 0x1af   :  { %v3834_v58 = vpack.c.bf16 %v1568_v57, %v1561_v54  ;;  %v1630_v54 = vsub.f32 %v3802_v22, %v4102_v50 }
 0x1b1   :  { %2859 = vmatpush3.bf16.msra.mxu1 %v3746_v61  ;;  %v1631_v13 = vand.u32 4294901760, %v1630_v54  ;;  %v2900_v54 = vpack.c.bf16 %v3727_v4, %v3725_v32  ;;  %v2954_v32 = vpack.c.bf16 %v1594_v18, %v1587_v23  ;;  %v4194_v4 = vand.u32 4294901760, %v3743_v46 }
 0x1b2   :  { %2860 = vmatprep.subr.bf16.mxu1 %v3022_v39 }
 0x1b5   :  { %2862 = vmatpush3.bf16.msra.mxu1 %v3750_v63 }
 0x1b6   :  { %2863 = vmatprep.subr.bf16.mxu1 %v3022_v39 }
 0x1b9   :  { %2865 = vmatpush3.bf16.msra.mxu1 %v3764_v8 }
 0x1ba   :  { %2866 = vmatprep.subr.bf16.mxu1 %v3022_v39 }
 0x1bd   :  { %2868 = vmatpush3.bf16.msra.mxu1 %v3776_v31 }
 0x1be   :  { %2869 = vmatprep.subr.bf16.mxu1 %v3022_v39 }
 0x1c1   :  { %2871 = vmatpush3.bf16.msra.mxu1 %v3786_v25 }
 0x1c2   :  { %2872 = vmatprep.subr.bf16.mxu1 %v3022_v39 }
 0x1d8   :  { %v2145_v35 = vpop.f32.mrb[2].mxu0 }
 0x1d9   :  { %v2146_v36 = vpop.f32.mrb[3].mxu0 }
 0x1da   :  { %v2147_v37 = vadd.f32 %v2146_v36, %v2145_v35  ;;  %v3808_v35 = vsub.f32 %v1455_v34, %v1505_v9  ;;  %v3810_v36 = vpack.c.bf16 %v1511_v53, %v1508_v3  ;;  %v1616_v34 = vsub.f32 %v3798_v45, %v4104_v28 }
 0x1dc   :  { %v688_v16 = vadd.f32 %v2147_v37, %v2111_v42  ;;  %v3812_v37 = vsub.f32 %v1456_v26, %v1508_v3  ;;  %2874 = vmatpush3.bf16.msra.mxu1 %v3810_v36  ;;  %v1601_v42 = vand.u32 4294901760, %v3741_v60  ;;  %v1617_v9 = vand.u32 4294901760, %v1616_v34 }
 0x1dd   :  { %2875 = vmatprep.subr.bf16.mxu1 %v3022_v39  ;;  %v1624_v26 = vand.u32 4294901760, %v1623_v24  ;;  %v4101_v3 = vand.u32 4294901760, %v3804_v33  ;;  %v4099_v6 = vand.u32 4294901760, %v3808_v35  ;;  %v4097_v34 = vand.u32 4294901760, %v3814_v40 }
 0x1de   :  { %v1602_v10 = vsub.f32 %v3741_v60, %v1601_v42 }
 0x1df   :  { %v2888_v59 = vpack.c.bf16 %v1624_v26, %v1617_v9  ;;  %v1637_v57 = vsub.f32 %v3804_v33, %v4101_v3  ;;  %v1665_v9 = vsub.f32 %v3814_v40, %v4097_v34 }
 0x1e1   :  { %v1638_v17 = vand.u32 4294901760, %v1637_v57  ;;  %v2903_v57 = vpack.c.bf16 %v3731_v62, %v3729_v52  ;;  %v2957_v52 = vpack.c.bf16 %v4194_v4, %v1601_v42  ;;  %v4195_v62 = vand.u32 4294901760, %v3798_v45 }
 0x1f8   :  { %v2180_v7 = vpop.f32.mrb[4].mxu0 }
 0x1f9   :  { %v2181_v19 = vpop.f32.mrb[5].mxu0 }
 0x1fa   :  { %v2182_v12 = vadd.f32 %v2181_v19, %v2180_v7  ;;  %v4105_v7 = vand.u32 4294901760, %v3743_v46  ;;  %v3848_v19 = vpack.c.bf16 %v1596_v1, %v1589_v41  ;;  %v2891_v41 = vpack.c.bf16 %v1638_v17, %v1631_v13 }
 0x1fb   :  { %v1644_v1 = vsub.f32 %v3806_v48, %v4100_v21  ;;  %v2909_v13 = vpack.c.bf16 %v3743_v46, %v3741_v60  ;;  %v4199_v60 = vand.u32 4294901760, %v3806_v48 }
 0x1fc   :  { %v3774_v29 = vadd.f32 %v2182_v12, %v688_v16  ;;  %v1609_v11 = vsub.f32 %v3743_v46, %v4105_v7  ;;  %v1603_v16 = vand.u32 4294901760, %v1602_v10  ;;  %v1651_v10 = vsub.f32 %v3808_v35, %v4099_v6 }
 0x1fd   :  { %v4200_v46 = vand.u32 4294901760, %v3808_v35 }
 0x1fe   :  { %v1610_v12 = vand.u32 4294901760, %v1609_v11  ;;  %v1645_v11 = vand.u32 4294901760, %v1644_v1  ;;  %v2912_v1 = vpack.c.bf16 %v3800_v2, %v3798_v45  ;;  %v4201_v45 = vand.u32 4294901760, %v3812_v37 }
 0x200   :  { %v3858_v27 = vpack.c.bf16 %v1610_v12, %v1603_v16  ;;  %v1652_v16 = vand.u32 4294901760, %v1651_v10  ;;  %v4098_v12 = vand.u32 4294901760, %v3812_v37 }
 0x202   :  { %v2894_v24 = vpack.c.bf16 %v1652_v16, %v1645_v11 }
 0x218   :  { %v2215_v53 = vpop.f32.mrb[6].mxu0 }
 0x219   :  { %v2216_v51 = vpop.f32.mrb[7].mxu0 }
 0x21a   :  { %v2217_v38 = vadd.f32 %v2216_v51, %v2215_v53  ;;  %v1666_v53 = vand.u32 4294901760, %v1665_v9  ;;  %v2918_v9 = vpack.c.bf16 %v3808_v35, %v3806_v48 }
 0x21c   :  { %v1058_v43 = vadd.f32 %v2217_v38, %v3774_v29  ;;  %v1658_v29 = vsub.f32 %v3812_v37, %v4098_v12  ;;  %v2906_v38 = vpack.c.bf16 %v3738_v49, %v3733_v56  ;;  %v4197_v56 = vand.u32 4294901760, %v3802_v22 }
 0x21d   :  { %v4198_v49 = vand.u32 4294901760, %v3804_v33 }
 0x21e   :  { %v1659_v26 = vand.u32 4294901760, %v1658_v29  ;;  %v2915_v29 = vpack.c.bf16 %v3804_v33, %v3802_v22 }
 0x220   :  { %v2897_v51 = vpack.c.bf16 %v1666_v53, %v1659_v26  ;;  %v2921_v26 = vpack.c.bf16 %v3814_v40, %v3812_v37 }
 0x238   :  { %v2250_v17 = vpop.f32.mrb[8].mxu0 }
 0x239   :  { %v2251_v10 = vpop.f32.mrb[9].mxu0 }
 0x23a   :  { %v2252_v11 = vadd.f32 %v2251_v10, %v2250_v17 }
 0x23c   :  { %v1166_v16 = vadd.f32 %v2252_v11, %v1058_v43 }
 0x258   :  { %v2285_v53 = vpop.f32.mrb[10].mxu0 }
 0x259   :  { %v2286_v34 = vpop.f32.mrb[11].mxu0 }
 0x25a   :  { %v2287_v12 = vadd.f32 %v2286_v34, %v2285_v53 }
 0x25c   :  { %v1334_v6 = vadd.f32 %v2287_v12, %v1166_v16 }
 0x278   :  { %v2320_v21 = vpop.f32.mrb[12].mxu0 }
 0x279   :  { %v2321_v3 = vpop.f32.mrb[13].mxu0 }
 0x27a   :  { %v2322_v50 = vadd.f32 %v2321_v3, %v2320_v21 }
 0x27c   :  { %v1438_v14 = vadd.f32 %v2322_v50, %v1334_v6 }
 0x27e   :  { %v1441_v28 = vmax.f32 %v1438_v14, 0.0 }
 0x280   :  { %v3907_v17 = vand.u32 4294901760, %v1441_v28 }
 0x282   :  { %v1547_v43 = vsub.f32 %v1441_v28, %v3907_v17 }
 0x284   :  { %v1548_v10 = vand.u32 4294901760, %v1547_v43 }
 0x286   :  { %v1549_v11 = vsub.f32 %v1547_v43, %v1548_v10 }
 0x288   :  { %v1550_v7 = vand.u32 4294901760, %v1549_v11 }
 0x28a   :  { %2458 = vmatmul.mubr.f32.vlgmr.msra.gmra.mrb[2].mxu1 %v1550_v7 }
 0x28b   :  { %2877 = vmatpush3.bf16.msra.mxu1 %v3834_v58  ;;  %2492 = vmatprep.mubr.msk.f32.mxu1 %vm3023_vm1, %v4193_v47  ;;  %v2948_v58 = vpack.c.bf16 %v1566_v5, %v1559_v55  ;;  %v4196_v55 = vand.u32 4294901760, %v3800_v2  ;;  %v4202_v2 = vand.u32 4294901760, %v3814_v40 }
 0x28c   :  { %2878 = vmatprep.subr.bf16.mxu1 %v3022_v39 }
 0x28d   :  { %v2960_v5 = vpack.c.bf16 %v4196_v55, %v4195_v62  ;;  %v2969_v23 = vpack.c.bf16 %v4202_v2, %v4201_v45 }
 0x28f   :  { %2880 = vmatpush3.bf16.msra.mxu1 %v3838_v0  ;;  %v2951_v0 = vpack.c.bf16 %v1580_v20, %v1573_v15  ;;  %v2963_v15 = vpack.c.bf16 %v4198_v49, %v4197_v56  ;;  %v2966_v20 = vpack.c.bf16 %v4200_v46, %v4199_v60 }
 0x290   :  { %2881 = vmatprep.subr.bf16.mxu1 %v3022_v39 }
 0x293   :  { %2883 = vmatpush3.bf16.msra.mxu1 %v3848_v19 }
 0x294   :  { %2884 = vmatprep.subr.bf16.mxu1 %v3022_v39 }
 0x297   :  { %2886 = vmatpush3.bf16.msra.mxu1 %v3858_v27 }
 0x298   :  { %2887 = vmatprep.subr.bf16.mxu1 %v3022_v39 }
 0x29b   :  { %2889 = vmatpush3.bf16.msra.mxu1 %v2888_v59 }
 0x29c   :  { %2890 = vmatprep.subr.bf16.mxu1 %v3022_v39 }
 0x29f   :  { %2892 = vmatpush3.bf16.msra.mxu1 %v2891_v41 }
 0x2a0   :  { %2893 = vmatprep.subr.bf16.mxu1 %v3022_v39 }
 0x2a3   :  { %2895 = vmatpush3.bf16.msra.mxu1 %v2894_v24 }
 0x2a4   :  { %2896 = vmatprep.subr.bf16.mxu1 %v3022_v39 }
 0x2a7   :  { %2898 = vmatpush3.bf16.msra.mxu1 %v2897_v51 }
 0x2a8   :  { %2899 = vmatprep.subr.bf16.mxu1 %v3022_v39 }
 0x2aa   :  { %2493 = vmatmul.mubr.f32.vlgmr.msra.gmra.mrb[2].mxu1 %v3907_v17 }
 0x2ab   :  { %2901 = vmatpush3.bf16.msra.mxu1 %v2900_v54  ;;  %2527 = vmatprep.mubr.msk.f32.mxu1 %vm3023_vm1, %v4193_v47 }
 0x2ac   :  { %2902 = vmatprep.subr.bf16.mxu1 %v3022_v39 }
 0x2af   :  { %2904 = vmatpush3.bf16.msra.mxu1 %v2903_v57 }
 0x2b0   :  { %2905 = vmatprep.subr.bf16.mxu1 %v3022_v39 }
 0x2b3   :  { %2907 = vmatpush3.bf16.msra.mxu1 %v2906_v38 }
 0x2b4   :  { %2908 = vmatprep.subr.bf16.mxu1 %v3022_v39 }
 0x2b7   :  { %2910 = vmatpush3.bf16.msra.mxu1 %v2909_v13 }
 0x2b8   :  { %2911 = vmatprep.subr.bf16.mxu1 %v3022_v39 }
 0x2bb   :  { %2913 = vmatpush3.bf16.msra.mxu1 %v2912_v1 }
 0x2bc   :  { %2914 = vmatprep.subr.bf16.mxu1 %v3022_v39 }
 0x2bf   :  { %2916 = vmatpush3.bf16.msra.mxu1 %v2915_v29 }
 0x2c0   :  { %2917 = vmatprep.subr.bf16.mxu1 %v3022_v39 }
 0x2c3   :  { %2919 = vmatpush3.bf16.msra.mxu1 %v2918_v9 }
 0x2c4   :  { %2920 = vmatprep.subr.bf16.mxu1 %v3022_v39 }
 0x2c7   :  { %2922 = vmatpush3.bf16.msra.mxu1 %v2921_v26 }
 0x2c8   :  { %2923 = vmatprep.subr.bf16.mxu1 %v3022_v39 }
 0x2ca   :  { %2528 = vmatmul.mubr.f32.vlgmr.msra.gmra.mrb[2].mxu1 %v1547_v43 }
 0x2cb   :  { %2925 = vmatpush3.bf16.msra.mxu1 %v3723_v44  ;;  %2562 = vmatprep.mubr.msk.f32.mxu1 %vm3023_vm1, %v4193_v47 }
 0x2cc   :  { %2926 = vmatprep.subr.bf16.mxu1 %v3022_v39 }
 0x2cf   :  { %2928 = vmatpush3.bf16.msra.mxu1 %v3736_v30 }
 0x2d0   :  { %2929 = vmatprep.subr.bf16.mxu1 %v3022_v39 }
 0x2d3   :  { %2931 = vmatpush3.bf16.msra.mxu1 %v3746_v61 }
 0x2d4   :  { %2932 = vmatprep.subr.bf16.mxu1 %v3022_v39 }
 0x2d7   :  { %2934 = vmatpush3.bf16.msra.mxu1 %v3750_v63 }
 0x2d8   :  { %2935 = vmatprep.subr.bf16.mxu1 %v3022_v39 }
 0x2db   :  { %2937 = vmatpush3.bf16.msra.mxu1 %v3764_v8 }
 0x2dc   :  { %2938 = vmatprep.subr.bf16.mxu1 %v3022_v39 }
 0x2df   :  { %2940 = vmatpush3.bf16.msra.mxu1 %v3776_v31 }
 0x2e0   :  { %2941 = vmatprep.subr.bf16.mxu1 %v3022_v39 }
 0x2e3   :  { %2943 = vmatpush3.bf16.msra.mxu1 %v3786_v25 }
 0x2e4   :  { %2944 = vmatprep.subr.bf16.mxu1 %v3022_v39 }
 0x2e7   :  { %2946 = vmatpush3.bf16.msra.mxu1 %v3810_v36 }
 0x2e8   :  { %2947 = vmatprep.subr.bf16.mxu1 %v3022_v39 }
 0x2ea   :  { %2563 = vmatmul.mubr.f32.vlgmr.msra.gmra.mrb[2].mxu1 %v1548_v10 }
 0x2eb   :  { %2949 = vmatpush3.bf16.msra.mxu1 %v2948_v58  ;;  %2597 = vmatprep.mubr.msk.f32.mxu1 %vm3023_vm1, %v4193_v47 }
 0x2ec   :  { %2950 = vmatprep.subr.bf16.mxu1 %v3022_v39 }
 0x2ef   :  { %2952 = vmatpush3.bf16.msra.mxu1 %v2951_v0 }
 0x2f0   :  { %2953 = vmatprep.subr.bf16.mxu1 %v3022_v39 }
 0x2f3   :  { %2955 = vmatpush3.bf16.msra.mxu1 %v2954_v32 }
 0x2f4   :  { %2956 = vmatprep.subr.bf16.mxu1 %v3022_v39 }
 0x2f7   :  { %2958 = vmatpush3.bf16.msra.mxu1 %v2957_v52 }
 0x2f8   :  { %2959 = vmatprep.subr.bf16.mxu1 %v3022_v39 }
 0x2fb   :  { %2961 = vmatpush3.bf16.msra.mxu1 %v2960_v5 }
 0x2fc   :  { %2962 = vmatprep.subr.bf16.mxu1 %v3022_v39 }
 0x2ff   :  { %2964 = vmatpush3.bf16.msra.mxu1 %v2963_v15 }
 0x300   :  { %2965 = vmatprep.subr.bf16.mxu1 %v3022_v39 }
 0x303   :  { %2967 = vmatpush3.bf16.msra.mxu1 %v2966_v20 }
 0x304   :  { %2968 = vmatprep.subr.bf16.mxu1 %v3022_v39 }
 0x307   :  { %2970 = vmatpush3.bf16.msra.mxu1 %v2969_v23 }
 0x308   :  { %2971 = vmatprep.subr.bf16.mxu1 %v3022_v39 }
 0x30a   :  { %2598 = vmatmul.mubr.f32.vlgmr.msra.gmra.mrb[2].mxu1 %v3907_v17 }
 0x30b   :  { %2973 = vmatpush3.bf16.msra.mxu1 %v3723_v44  ;;  %2632 = vmatprep.mubr.msk.f32.mxu1 %vm3023_vm1, %v4193_v47  ;;  %v2112_v44 = vld [vmem:[%s4026_s6] ss:$0 sm:$0xff] }
 0x30c   :  { %2974 = vmatprep.subr.bf16.mxu1 %v3022_v39 }
 0x30f   :  { %2976 = vmatpush3.bf16.msra.mxu1 %v3736_v30 }
 0x310   :  { %2977 = vmatprep.subr.bf16.mxu1 %v3022_v39 }
 0x313   :  { %2979 = vmatpush3.bf16.msra.mxu1 %v3746_v61 }
 0x314   :  { %2980 = vmatprep.subr.bf16.mxu1 %v3022_v39 }
 0x317   :  { %2982 = vmatpush3.bf16.msra.mxu1 %v3750_v63 }
 0x318   :  { %2983 = vmatprep.subr.bf16.mxu1 %v3022_v39 }
 0x31b   :  { %2985 = vmatpush3.bf16.msra.mxu1 %v3764_v8 }
 0x31c   :  { %2986 = vmatprep.subr.bf16.mxu1 %v3022_v39 }
 0x31f   :  { %2988 = vmatpush3.bf16.msra.mxu1 %v3776_v31 }
 0x320   :  { %2989 = vmatprep.subr.bf16.mxu1 %v3022_v39 }
 0x323   :  { %2991 = vmatpush3.bf16.msra.mxu1 %v3786_v25 }
 0x324   :  { %2992 = vmatprep.subr.bf16.mxu1 %v3022_v39 }
 0x327   :  { %2994 = vmatpush3.bf16.msra.mxu1 %v3810_v36 }
 0x32a   :  { %2633 = vmatmul.mubr.f32.vlgmr.msra.gmra.mrb[2].mxu1 %v3907_v17 }
 0x3fd   :  { %v2102_v30 = vpop.f32.mrb[2].mxu1 }
 0x3fe   :  { %v2999_v61 = vadd.f32 %v2112_v44, %v2102_v30  ;;  %v2634_v63 = vpop.f32.mrb[3].mxu1 }
 0x400   :  { %2106 = vst [vmem:[%s4027_s7] sm:$0xf] %v2999_v61 }

</bundles_post_ra>
